<compile_context>
chip_gen: v5e
topology: v5e:2x2
jax: 0.10.0
libtpu: 0.0.40
codegen_flags: <defaults>
</compile_context>

<pallas_src>
import functools

import jax
import jax.numpy as jnp
from jax.experimental import pallas as pl
from jax.experimental.pallas import tpu as pltpu


def _clone_dma_kernel(x_hbm, o_hbm, sem):
    # Single HBM->HBM async copy of the whole array: the DMA engine moves the
    # bytes; the TensorCore only issues the descriptor and waits on the sem.
    cp = pltpu.make_async_copy(x_hbm, o_hbm, sem)
    cp.start()
    cp.wait()


@functools.lru_cache(maxsize=None)
def _build_clone(shape, dtype_name):
    dtype = jnp.dtype(dtype_name)
    nbytes = int(jnp.prod(jnp.array(shape, dtype=jnp.int64))) * dtype.itemsize if shape else dtype.itemsize

    call = pl.pallas_call(
        _clone_dma_kernel,
        out_shape=jax.ShapeDtypeStruct(shape, dtype),
        # Leave both operands in HBM; the kernel moves them with one DMA.
        in_specs=[pl.BlockSpec(memory_space=pl.ANY)],
        out_specs=pl.BlockSpec(memory_space=pl.ANY),
        scratch_shapes=[pltpu.SemaphoreType.DMA(())],
        # Pure memory op: 0 flops, read nbytes + write nbytes.
        cost_estimate=pl.CostEstimate(
            flops=0, transcendentals=0, bytes_accessed=2 * nbytes),
    )
    return jax.jit(call)


def mock_module_forward(x):
    """Pallas equivalent of MockModule.forward: returns a detached clone of x."""
    x = jnp.asarray(x)
    orig_shape = x.shape

    # Keep the array at least 2-D so the HBM ref has a conventional
    # (sublane, lane) view; for ndim >= 2 the array is passed through as-is
    # (the DMA is a flat copy, so no lane-density / tiling concerns).
    if x.ndim == 0:
        x2 = x.reshape(1, 1)
    elif x.ndim == 1:
        x2 = x.reshape(1, -1)
    else:
        x2 = x

    out = _build_clone(tuple(x2.shape), str(x2.dtype))(x2)
    return out.reshape(orig_shape)


class MockModuleJAX:
    """Mirrors the stateful behavior of the PyTorch MockModule."""

    def __init__(self, data=None):
        self.data = data

    def forward(self, inputs=None):
        if inputs is not None:
            self.data = inputs
        # clone().detach() -> fresh copy via a single HBM->HBM DMA.
        return mock_module_forward(self.data)


if __name__ == "__main__":
    key = jax.random.PRNGKey(0)
    # Small NCHW-ish tensor consistent with typical test inputs.
    x = jax.random.normal(key, (2, 4, 16, 16), dtype=jnp.float32)

    mod = MockModuleJAX()
    out = jax.block_until_ready(mod.forward(x))

    assert out.shape == x.shape
    assert out.dtype == x.dtype
    assert bool(jnp.all(out == x))

    # Also exercise the "no inputs -> reuse stored data" path (and the
    # cached, pre-jitted pallas_call).
    out2 = jax.block_until_ready(mod.forward(None))
    assert out2.shape == x.shape
    assert bool(jnp.all(out2 == x))

    # And a 1-D path (full-array copy, shape-agnostic).
    v = jax.random.normal(jax.random.PRNGKey(0), (37,), dtype=jnp.float32)
    outv = jax.block_until_ready(mock_module_forward(v))
    assert outv.shape == v.shape
    assert bool(jnp.all(outv == v))

    # Scalar path.
    s = jnp.float32(3.25)
    outs = jax.block_until_ready(mock_module_forward(s))
    assert outs.shape == s.shape
    assert bool(outs == s)

    print("KERNEL_OK")
</pallas_src>

<mosaic_0001>
module attributes {stable_mosaic.version = 11 : i64} {
  func.func @_clone_dma_kernel(%arg0: memref<2x4x16x16xf32, #tpu.memory_space<any>>, %arg1: memref<2x4x16x16xf32, #tpu.memory_space<any>>, %arg2: memref<!tpu.dma_semaphore, #tpu.memory_space<semaphore_mem>>) attributes {dimension_semantics = [], scalar_prefetch = 0 : i64, scratch_operands = 1 : i64, tpu.core_type = #tpu.core_type<tc>} {
    tpu.enqueue_dma source(%arg0 : memref<2x4x16x16xf32, #tpu.memory_space<any>>) target(%arg1 : memref<2x4x16x16xf32, #tpu.memory_space<any>>) target_semaphore(%arg2 : memref<!tpu.dma_semaphore, #tpu.memory_space<semaphore_mem>>)
    tpu.wait_dma2 semaphore(%arg2 : memref<!tpu.dma_semaphore, #tpu.memory_space<semaphore_mem>>) src(%arg0 : memref<2x4x16x16xf32, #tpu.memory_space<any>>) dst(%arg1 : memref<2x4x16x16xf32, #tpu.memory_space<any>>)
    return
  }
}

</mosaic_0001>

<bundles_post_ra>
// kernel: tpu_custom_call.1
= control target key start
LH: loop header
LB: loop body
LE: loop exit
PB: predicated region body
PF: predicated region fallthrough
CT: control target
= control target key end

     0   :  { %s34_s12 = smov [#allocation2]   ;;  %s35_s13 = smov [#allocation3]   ;;  %s53_s0 = inlined_call_operand.hbm [shape: f32[2,4,16,16], index: 0, kind: input, shape index: {}]   ;;  %s54_s1 = inlined_call_operand.hbm [shape: f32[2,4,16,16], index: 1, kind: output, shape index: {}]  }
   0x1   :  { %s10_s8 = sshll.u32 %s53_s0, 4  ;;  %s12_s11 = sshll.u32 %s54_s1, 4  ;;  %s11_s8 = int_to_ptr.hbm [resolvable:$true] %s10_s8  ;;  %s13_s11 = int_to_ptr.hbm [resolvable:$true] %s12_s11 }
   0x2   :  { %s36_s14 = smov 0  }
   0x3   :  { %16 = dma.general %s11_s8, 2048, %s13_s11, %s34_s12, %s35_s13, [#allocation4], %s36_s14, 0  }
   0x4   :  { %32 = dma.done.wait [#allocation2], 2048 }
   0x5   :  { %33 = vsyncadd [#allocation2], 4294965248 }
   0x6   :  { %22 = vsyncmov [#allocation2] }
   0x9   :  { %s23_s15 = vpop.sfrf %22 }
   0xa   :  { %p28_p0 = scmp.ne.s32.totalorder %s23_s15, 0 }
   0xc   :  { %27 = shalt.err (%p28_p0)  }

</bundles_post_ra>
